<compile_context>
chip_gen: v6e
topology: v6e:2x2x1
jax: 0.10.0
libtpu: 0.0.40
codegen_flags: <defaults>
</compile_context>

<pallas_src>
import functools

import jax
import jax.numpy as jnp
from jax.experimental import pallas as pl
from jax.experimental.pallas import tpu as pltpu


def _round_up(x, m):
    return (x + m - 1) // m * m


def _mlp_fused_kernel(*refs, num_layers, sigmoid_output, approx_sigmoid):
    """refs = (x_ref, w1_ref, b1_ref, ..., wL_ref, bL_ref, o_ref).

    Computes  y = [sigmoid]( relu(...relu(x@W1+b1)...)@WL + bL )  on one
    row-tile of x.  Dots accumulate in f32 (preferred_element_type); the
    activation is cast to the weight dtype right before each dot so the MXU
    sees a matched-precision pair; the epilogue stays f32.
    """
    x_ref, o_ref = refs[0], refs[-1]
    h = x_ref[...]
    for layer in range(num_layers):
        w_ref = refs[1 + 2 * layer]
        b_ref = refs[2 + 2 * layer]
        h = jnp.dot(h.astype(w_ref.dtype), w_ref[...],
                    preferred_element_type=jnp.float32)
        h = h + b_ref[...].astype(jnp.float32)           # (1, N) broadcast
        if layer < num_layers - 1:
            h = jnp.maximum(h, 0.0)
    if sigmoid_output:
        # Divide lands on the EUP/recip path; approx=True only when the caller
        # has already accepted reduced precision (bf16 fast path).
        h = pl.reciprocal(1.0 + jnp.exp(-h), approx=approx_sigmoid)
    o_ref[...] = h.astype(o_ref.dtype)


def prepare_mlp_params(params, *, compute_dtype=jnp.bfloat16):
    """One-time parameter prep.

    params: list of (W, b) in torch nn.Linear layout (W: (out, in), b: (out,)).
    Returns (weights, biases, output_dim): weights transposed once to
    (in, out) in `compute_dtype`, biases as (1, out) float32.  No lane
    padding — the output block's last dim equals the full array dim.
    """
    output_dim = params[-1][0].shape[0]
    weights, biases = [], []
    for W, bvec in params:
        w = jnp.asarray(W, jnp.float32).T                  # (in, out)
        b = jnp.asarray(bvec, jnp.float32).reshape(1, -1)  # (1, out)
        weights.append(w.astype(compute_dtype))
        biases.append(b)
    return weights, biases, output_dim


def _pick_row_tile(M):
    """Row tile: multiple of 8, or equal to M (full-array block)."""
    if M <= 512:
        return M                                  # one step; launch cost dominates
    if M <= 4096:
        return _round_up(pl.cdiv(M, 2), 8)        # 2 steps -> both v7x TCs busy
    return 2048                                   # ~85%+ of HBM roofline, tiny VMEM


def mlp_forward(x, weights, biases, output_dim, *, sigmoid_output=False,
                out_dtype=None, approx_sigmoid=False, row_tile=None):
    """Fused MLP forward.  x: (..., input_dim).

    row_tile (if given) must be a multiple of 8 or equal to the flattened row
    count.  out_dtype defaults to x.dtype; pass jnp.bfloat16 to halve output
    HBM write bytes on the fast path.
    """
    lead = x.shape[:-1]
    D = x.shape[-1]
    xf = x.reshape(-1, D)
    M = xf.shape[0]
    num_layers = len(weights)
    N_out = weights[-1].shape[1]
    assert N_out == output_dim
    out_dtype = x.dtype if out_dtype is None else out_dtype

    tm = _pick_row_tile(M) if row_tile is None else row_tile
    grid = (pl.cdiv(M, tm),)   # ragged M handled by partial blocks (rows independent)

    in_specs = [pl.BlockSpec((tm, D), lambda i: (i, 0))]          # row tile of x
    for w, b in zip(weights, biases):
        in_specs.append(pl.BlockSpec(w.shape, lambda i: (0, 0)))  # full weight, resident
        in_specs.append(pl.BlockSpec(b.shape, lambda i: (0, 0)))  # full bias, resident
    out_spec = pl.BlockSpec((tm, N_out), lambda i: (i, 0))

    kernel = functools.partial(_mlp_fused_kernel,
                               num_layers=num_layers,
                               sigmoid_output=sigmoid_output,
                               approx_sigmoid=approx_sigmoid)
    flat_params = [a for wb in zip(weights, biases) for a in wb]

    yf = pl.pallas_call(
        kernel,
        out_shape=jax.ShapeDtypeStruct((M, N_out), out_dtype),
        grid_spec=pl.GridSpec(grid=grid, in_specs=in_specs, out_specs=out_spec),
        compiler_params=pltpu.CompilerParams(
            dimension_semantics=("parallel",)),
    )(xf, *flat_params)

    return yf.reshape(lead + (output_dim,))


def init_mlp_params(key, input_dim, hidden_dim, output_dim, num_layers):
    """Deterministic init mirroring torch nn.Linear (uniform +-1/sqrt(fan_in)),
    stored in torch layout: W (out, in), b (out,)."""
    h = [hidden_dim] * (num_layers - 1)
    dims = list(zip([input_dim] + h, h + [output_dim]))
    params = []
    for (n_in, n_out) in dims:
        key, kw, kb = jax.random.split(key, 3)
        bound = 1.0 / float(n_in) ** 0.5
        W = jax.random.uniform(kw, (n_out, n_in), jnp.float32, -bound, bound)
        bvec = jax.random.uniform(kb, (n_out,), jnp.float32, -bound, bound)
        params.append((W, bvec))
    return params


def mlp_forward_ref(x, params, sigmoid_output=False):
    """Pure-JAX f32 reference matching the PyTorch module."""
    num_layers = len(params)
    for i, (W, bvec) in enumerate(params):
        x = x @ W.T + bvec
        if i < num_layers - 1:
            x = jnp.maximum(x, 0.0)
    if sigmoid_output:
        x = jax.nn.sigmoid(x)
    return x


if __name__ == "__main__":
    # Shapes consistent with SAM's decoder MLP usage.
    batch, seq = 2, 8
    input_dim, hidden_dim, output_dim, num_layers = 32, 32, 16, 3
    sigmoid_output = True

    key = jax.random.PRNGKey(0)
    kx, kp, kx2 = jax.random.split(key, 3)
    x = jax.random.normal(kx, (batch, seq, input_dim), dtype=jnp.float32)
    params = init_mlp_params(kp, input_dim, hidden_dim, output_dim, num_layers)

    ref = mlp_forward_ref(x, params, sigmoid_output=sigmoid_output)

    # 1) Exact-semantics path: f32 weights, exact sigmoid, tight tolerance.
    w32, b32, od = prepare_mlp_params(params, compute_dtype=jnp.float32)
    out_f32 = jax.block_until_ready(
        mlp_forward(x, w32, b32, od, sigmoid_output=sigmoid_output))
    assert out_f32.shape == (batch, seq, output_dim), out_f32.shape
    assert jnp.allclose(out_f32, ref, atol=1e-5, rtol=1e-5), "f32 mismatch vs reference"

    # 2) Fast path: bf16 weights/activations into the MXU, f32 accumulation +
    #    f32 epilogue, approx (EUP) sigmoid, bf16 output (halves HBM writes).
    wbf, bbf, od = prepare_mlp_params(params, compute_dtype=jnp.bfloat16)
    out_bf16 = jax.block_until_ready(
        mlp_forward(x, wbf, bbf, od, sigmoid_output=sigmoid_output,
                    out_dtype=jnp.bfloat16, approx_sigmoid=True))
    assert out_bf16.shape == (batch, seq, output_dim), out_bf16.shape
    assert out_bf16.dtype == jnp.bfloat16
    assert jnp.allclose(out_bf16.astype(jnp.float32), ref, atol=5e-2, rtol=5e-2), \
        "bf16 mismatch vs reference"

    # 3) Ragged multi-step grid path (exercises pl.cdiv + partial last block,
    #    which replaced the wrapper-side jnp.pad/slice): M = 5*200 = 1000 rows.
    x2 = jax.random.normal(kx2, (5, 200, input_dim), dtype=jnp.float32)
    ref2 = mlp_forward_ref(x2, params, sigmoid_output=sigmoid_output)
    out2 = jax.block_until_ready(
        mlp_forward(x2, w32, b32, od, sigmoid_output=sigmoid_output))
    assert out2.shape == (5, 200, output_dim), out2.shape
    assert jnp.allclose(out2, ref2, atol=1e-5, rtol=1e-5), "ragged-M mismatch vs reference"

    print("KERNEL_OK")
</pallas_src>

<mosaic_0001>
module attributes {stable_mosaic.version = 11 : i64} {
  func.func @_mlp_fused_kernel(%arg0: i32, %arg1: memref<16x32xf32, #tpu.memory_space<vmem>>, %arg2: memref<32x32xf32, #tpu.memory_space<vmem>>, %arg3: memref<1x32xf32, #tpu.memory_space<vmem>>, %arg4: memref<32x32xf32, #tpu.memory_space<vmem>>, %arg5: memref<1x32xf32, #tpu.memory_space<vmem>>, %arg6: memref<32x16xf32, #tpu.memory_space<vmem>>, %arg7: memref<1x16xf32, #tpu.memory_space<vmem>>, %arg8: memref<16x16xf32, #tpu.memory_space<vmem>>) attributes {dimension_semantics = [#tpu.dimension_semantics<parallel>], iteration_bounds = array<i64: 1>, scalar_prefetch = 0 : i64, scratch_operands = 0 : i64, tpu.core_type = #tpu.core_type<tc>, window_params = [{transform_indices = @transform_0, window_bounds = array<i64: 16, 32>}, {pipeline_mode = #tpu.pipeline_mode<synchronous>, transform_indices = @transform_1, window_bounds = array<i64: 32, 32>}, {pipeline_mode = #tpu.pipeline_mode<synchronous>, transform_indices = @transform_2, window_bounds = array<i64: 1, 32>}, {pipeline_mode = #tpu.pipeline_mode<synchronous>, transform_indices = @transform_3, window_bounds = array<i64: 32, 32>}, {pipeline_mode = #tpu.pipeline_mode<synchronous>, transform_indices = @transform_4, window_bounds = array<i64: 1, 32>}, {pipeline_mode = #tpu.pipeline_mode<synchronous>, transform_indices = @transform_5, window_bounds = array<i64: 32, 16>}, {pipeline_mode = #tpu.pipeline_mode<synchronous>, transform_indices = @transform_6, window_bounds = array<i64: 1, 16>}, {transform_indices = @transform_7, window_bounds = array<i64: 16, 16>}]} {
    %c0 = arith.constant 0 : index
    %c0_0 = arith.constant 0 : index
    %0 = vector.load %arg1[%c0, %c0_0] : memref<16x32xf32, #tpu.memory_space<vmem>>, vector<16x32xf32>
    %c0_1 = arith.constant 0 : index
    %c0_2 = arith.constant 0 : index
    %1 = vector.load %arg2[%c0_1, %c0_2] : memref<32x32xf32, #tpu.memory_space<vmem>>, vector<32x32xf32>
    %cst = arith.constant dense<0.000000e+00> : vector<16x32xf32>
    %2 = tpu.matmul %0, %1, %cst {dimension_numbers = #tpu.dot_dimension_numbers<[1], [0], [0], [1], [0, 0, 1, 1], [], []>} : vector<16x32xf32>, vector<32x32xf32>, vector<16x32xf32> -> vector<16x32xf32>
    %c0_3 = arith.constant 0 : index
    %c0_4 = arith.constant 0 : index
    %3 = vector.load %arg3[%c0_3, %c0_4] : memref<1x32xf32, #tpu.memory_space<vmem>>, vector<1x32xf32>
    %4 = vector.broadcast %3 : vector<1x32xf32> to vector<16x32xf32>
    %5 = arith.addf %2, %4 : vector<16x32xf32>
    %cst_5 = arith.constant 0.000000e+00 : f32
    %6 = vector.broadcast %cst_5 : f32 to vector<16x32xf32>
    %7 = arith.maximumf %5, %6 : vector<16x32xf32>
    %c0_6 = arith.constant 0 : index
    %c0_7 = arith.constant 0 : index
    %8 = vector.load %arg4[%c0_6, %c0_7] : memref<32x32xf32, #tpu.memory_space<vmem>>, vector<32x32xf32>
    %cst_8 = arith.constant dense<0.000000e+00> : vector<16x32xf32>
    %9 = tpu.matmul %7, %8, %cst_8 {dimension_numbers = #tpu.dot_dimension_numbers<[1], [0], [0], [1], [0, 0, 1, 1], [], []>} : vector<16x32xf32>, vector<32x32xf32>, vector<16x32xf32> -> vector<16x32xf32>
    %c0_9 = arith.constant 0 : index
    %c0_10 = arith.constant 0 : index
    %10 = vector.load %arg5[%c0_9, %c0_10] : memref<1x32xf32, #tpu.memory_space<vmem>>, vector<1x32xf32>
    %11 = vector.broadcast %10 : vector<1x32xf32> to vector<16x32xf32>
    %12 = arith.addf %9, %11 : vector<16x32xf32>
    %cst_11 = arith.constant 0.000000e+00 : f32
    %13 = vector.broadcast %cst_11 : f32 to vector<16x32xf32>
    %14 = arith.maximumf %12, %13 : vector<16x32xf32>
    %c0_12 = arith.constant 0 : index
    %c0_13 = arith.constant 0 : index
    %15 = vector.load %arg6[%c0_12, %c0_13] : memref<32x16xf32, #tpu.memory_space<vmem>>, vector<32x16xf32>
    %cst_14 = arith.constant dense<0.000000e+00> : vector<16x16xf32>
    %16 = tpu.matmul %14, %15, %cst_14 {dimension_numbers = #tpu.dot_dimension_numbers<[1], [0], [0], [1], [0, 0, 1, 1], [], []>} : vector<16x32xf32>, vector<32x16xf32>, vector<16x16xf32> -> vector<16x16xf32>
    %c0_15 = arith.constant 0 : index
    %c0_16 = arith.constant 0 : index
    %17 = vector.load %arg7[%c0_15, %c0_16] : memref<1x16xf32, #tpu.memory_space<vmem>>, vector<1x16xf32>
    %18 = vector.broadcast %17 : vector<1x16xf32> to vector<16x16xf32>
    %19 = arith.addf %16, %18 : vector<16x16xf32>
    %cst_17 = arith.constant 0.000000e+00 : f32
    %20 = vector.broadcast %cst_17 : f32 to vector<16x16xf32>
    %21 = arith.subf %20, %19 : vector<16x16xf32>
    %22 = math.exp %21 : vector<16x16xf32>
    %cst_18 = arith.constant 1.000000e+00 : f32
    %23 = vector.broadcast %cst_18 : f32 to vector<16x16xf32>
    %24 = arith.addf %23, %22 : vector<16x16xf32>
    %25 = tpu.reciprocal %24 : vector<16x16xf32> -> vector<16x16xf32>
    %c0_19 = arith.constant 0 : index
    %c0_20 = arith.constant 0 : index
    %26 = vector.load %arg8[%c0_19, %c0_20] : memref<16x16xf32, #tpu.memory_space<vmem>>, vector<16x16xf32>
    tpu.vector_store %arg8[%c0_19, %c0_20], %25 {strides = array<i32>} : memref<16x16xf32, #tpu.memory_space<vmem>>, vector<16x16xf32>,
    return
  }
  func.func @transform_0(%arg0: i32) -> (i32, i32) {
    %c0_i32 = arith.constant 0 : i32
    %c0_i32_0 = arith.constant 0 : i32
    return %arg0, %c0_i32 : i32, i32
  }
  func.func @transform_1(%arg0: i32) -> (i32, i32) {
    %c0_i32 = arith.constant 0 : i32
    %c0_i32_0 = arith.constant 0 : i32
    %c0_i32_1 = arith.constant 0 : i32
    return %c0_i32, %c0_i32_0 : i32, i32
  }
  func.func @transform_2(%arg0: i32) -> (i32, i32) {
    %c0_i32 = arith.constant 0 : i32
    %c0_i32_0 = arith.constant 0 : i32
    %c0_i32_1 = arith.constant 0 : i32
    return %c0_i32, %c0_i32_0 : i32, i32
  }
  func.func @transform_3(%arg0: i32) -> (i32, i32) {
    %c0_i32 = arith.constant 0 : i32
    %c0_i32_0 = arith.constant 0 : i32
    %c0_i32_1 = arith.constant 0 : i32
    return %c0_i32, %c0_i32_0 : i32, i32
  }
  func.func @transform_4(%arg0: i32) -> (i32, i32) {
    %c0_i32 = arith.constant 0 : i32
    %c0_i32_0 = arith.constant 0 : i32
    %c0_i32_1 = arith.constant 0 : i32
    return %c0_i32, %c0_i32_0 : i32, i32
  }
  func.func @transform_5(%arg0: i32) -> (i32, i32) {
    %c0_i32 = arith.constant 0 : i32
    %c0_i32_0 = arith.constant 0 : i32
    %c0_i32_1 = arith.constant 0 : i32
    return %c0_i32, %c0_i32_0 : i32, i32
  }
  func.func @transform_6(%arg0: i32) -> (i32, i32) {
    %c0_i32 = arith.constant 0 : i32
    %c0_i32_0 = arith.constant 0 : i32
    %c0_i32_1 = arith.constant 0 : i32
    return %c0_i32, %c0_i32_0 : i32, i32
  }
  func.func @transform_7(%arg0: i32) -> (i32, i32) {
    %c0_i32 = arith.constant 0 : i32
    %c0_i32_0 = arith.constant 0 : i32
    return %arg0, %c0_i32 : i32, i32
  }
}

</mosaic_0001>

<bundles_post_ra>
// kernel: tpu_custom_call.1
= control target key start
LH: loop header
LB: loop body
LE: loop exit
PB: predicated region body
PF: predicated region fallthrough
CT: control target
= control target key end

     0   :  { %12 = vsyncpa [#allocation3], 0  ;;  %s571_s0 = inlined_call_operand.vmem [shape: f32[16,32], index: 0, kind: input, shape index: {}]   ;;  %s572_s1 = inlined_call_operand.vmem [shape: f32[32,32], index: 1, kind: input, shape index: {}]   ;;  %s573_s2 = inlined_call_operand.vmem [shape: f32[1,32], index: 2, kind: input, shape index: {}]   ;;  %s574_s3 = inlined_call_operand.hbm [shape: f32[32,32], index: 3, kind: input, shape index: {}]   ;;  %s575_s4 = inlined_call_operand.vmem [shape: f32[1,32], index: 4, kind: input, shape index: {}]   ;;  %s576_s5 = inlined_call_operand.vmem [shape: f32[32,16], index: 5, kind: input, shape index: {}]   ;;  %s577_s6 = inlined_call_operand.vmem [shape: f32[1,16], index: 6, kind: input, shape index: {}]   ;;  %s578_s7 = inlined_call_operand.hbm [shape: f32[16,16], index: 7, kind: output, shape index: {}]  }
   0x1   :  { %13 = vsyncpa [#allocation4], 0  ;;  %s470_s24 = smov [#allocation2]  }
   0x2   :  { %s25_s25 = sshll.u32 %s470_s24, 4  ;;  %s26_s25 = int_to_ptr.vmem [resolvable:$true] %s25_s25 }
   0x3   :  { %s434_s26 = scalar_lea.vmem %s26_s25, 512  ;;  %p439_p1 = scmp.lt.s32.totalorder %s26_s25, %s26_s25 }
   0x4   :  { %p435_p0 = scmp.ne.s32.totalorder %s26_s25, %s434_s26  ;;  %p440_p2 = scmp.lt.s32.totalorder %s434_s26, %s434_s26 }
   0x6   :  { %p441_p3 = por %p440_p2, %p439_p1 }
   0x8   :  { %p442_p4 = pnand %p441_p3, %p435_p0 }
   0xa   :  { %445 = shalt.err (!%p442_p4)
}
   0xb   :  { %s471_s27 = smov 128   ;;  %s472_s28 = smov 8  }
   0xc   :  { %31 = dma.hbm_to_vmem [thread:$0]  %s574_s3, 512, %s26_s25, [#allocation3], %s471_s27, %s471_s27, %s472_s28  }
   0xd   :  { %466 = dma.done.wait [#allocation3], 512  }
   0xe   :  { %467 = vsyncadd [#allocation3], 4294966784  ;;  %vm54_vm0 = vcmask 261120   ;;  %v46_v0 = vld [vmem:[%s572_s1 + $0x18] sm:$0xff]  ;;  %v45_v1 = vld [vmem:[%s572_s1 + $0x10] sm:$0xff]  ;;  %vm334_vm1 = vcmask 130048  }
   0xf   :  { %381 = vmatprep.subr.mxu0 %v46_v0  ;;  %v41_v2 = vld [vmem:[%s571_s0] sm:$0xff]  ;;  %v44_v3 = vld [vmem:[%s572_s1 + $0x8] sm:$0xff]  ;;  %v141_v6 = vld [vmem:[#allocation2 + $0x18] sm:$0xff] }
  0x10   :  { %382 = vmatpush3.msra.mxu0 %v46_v0  ;;  %389 = vmatprep.mubr.msk.f32.mxu0 %vm54_vm0, %v41_v2  ;;  %v43_v4 = vld [vmem:[%s572_s1] sm:$0xff]  ;;  %v42_v5 = vld [vmem:[%s571_s0 + $0x8] sm:$0xff]  ;;  %v140_v7 = vld [vmem:[#allocation2 + $0x10] sm:$0xff] }
  0x11   :  { %383 = vmatprep.subr.mxu0 %v45_v1  ;;  %392 = vmatprep.subr.mxu1 %v141_v6  ;;  %v139_v8 = vld [vmem:[#allocation2 + $0x8] sm:$0xff]  ;;  %v138_v9 = vld [vmem:[#allocation2] sm:$0xff]  ;;  %v235_v17 = vld [vmem:[%s576_s5 + $0x18] sm:$0xff] }
  0x12   :  { %384 = vmatpush3.msra.mxu0 %v45_v1  ;;  %393 = vmatpush3.msra.mxu1 %v141_v6  ;;  %v354_v10 = vld [vmem:[%s573_s2] ss:$0 sm:$0xff]  ;;  %v234_v18 = vld [vmem:[%s576_s5 + $0x10] sm:$0xff]  ;;  %v233_v19 = vld [vmem:[%s576_s5 + $0x8] sm:$0xff] }
  0x13   :  { %385 = vmatprep.subr.mxu0 %v44_v3  ;;  %394 = vmatprep.subr.mxu1 %v140_v7  ;;  %v232_v20 = vld [vmem:[%s576_s5] sm:$0xff] }
  0x14   :  { %386 = vmatpush3.msra.mxu0 %v44_v3  ;;  %395 = vmatpush3.msra.mxu1 %v140_v7  ;;  %v357_v21 = vld [vmem:[%s575_s4] ss:$0 sm:$0xff]  ;;  %s473_s4 = smov [#allocation5]  }
  0x15   :  { %387 = vmatprep.subr.mxu0 %v43_v4  ;;  %396 = vmatprep.subr.mxu1 %v139_v8  ;;  %v360_v28 = vld [vmem:[%s577_s6] ss:$0 sm:$0xff]  ;;  %s342_s5 = sshll.u32 %s473_s4, 4  ;;  %s343_s5 = int_to_ptr.vmem [resolvable:$true] %s342_s5 }
  0x16   :  { %388 = vmatpush3.msra.mxu0 %v43_v4  ;;  %397 = vmatpush3.msra.mxu1 %v139_v8  ;;  %s446_s6 = scalar_lea.vmem %s343_s5, 256  ;;  %p451_p6 = scmp.lt.s32.totalorder %s343_s5, %s343_s5 }
  0x17   :  { %390 = vmatmul.mubr.msk.f32.vlgmr.msra.gmra.mxu0 %vm54_vm0, %v42_v5  ;;  %398 = vmatprep.subr.mxu1 %v138_v9  ;;  %p447_p5 = scmp.ne.s32.totalorder %s343_s5, %s446_s6  ;;  %p452_p7 = scmp.lt.s32.totalorder %s446_s6, %s446_s6 }
  0x18   :  { %399 = vmatpush3.msra.mxu1 %v138_v9  ;;  %403 = vmatprep.subr.mxu0 %v235_v17 }
  0x19   :  { %404 = vmatpush3.msra.mxu0 %v235_v17  ;;  %p453_p8 = por %p452_p7, %p451_p6 }
  0x1a   :  { %405 = vmatprep.subr.mxu0 %v234_v18 }
  0x1b   :  { %406 = vmatpush3.msra.mxu0 %v234_v18  ;;  %p454_p9 = pnand %p453_p8, %p447_p5 }
  0x1c   :  { %407 = vmatprep.subr.mxu0 %v233_v19 }
  0x1d   :  { %408 = vmatpush3.msra.mxu0 %v233_v19 }
  0x1e   :  { %409 = vmatprep.subr.mxu0 %v232_v20 }
  0x1f   :  { %410 = vmatpush3.msra.mxu0 %v232_v20 }
  0xd7   :  { %v391_v11 = vpop.f32.mrf.mxu0 }
  0xd8   :  { %v133_v12 = vadd.f32 %v391_v11, %v354_v10 }
  0xd9   :  { %v127_v13 = vpop.f32.mrf.mxu0 }
  0xda   :  { %v128_v14 = vadd.f32 %v354_v10, %v127_v13  ;;  %v137_v16 = vmax.f32 %v133_v12, 0.0 }
  0xdc   :  { %v136_v15 = vmax.f32 %v128_v14, 0.0 }
  0xde   :  { %400 = vmatprep.mubr.msk.f32.mxu1 %vm54_vm0, %v136_v15 }
  0xdf   :  { %401 = vmatmul.mubr.msk.f32.vlgmr.msra.gmra.mxu1 %vm54_vm0, %v137_v16 }
 0x19f   :  { %v402_v22 = vpop.f32.mrf.mxu1 }
 0x1a0   :  { %v227_v23 = vadd.f32 %v402_v22, %v357_v21 }
 0x1a1   :  { %v221_v24 = vpop.f32.mrf.mxu1 }
 0x1a2   :  { %v222_v25 = vadd.f32 %v357_v21, %v221_v24  ;;  %v231_v27 = vmax.f32 %v227_v23, 0.0 }
 0x1a4   :  { %v230_v26 = vmax.f32 %v222_v25, 0.0 }
 0x1a6   :  { %411 = vmatprep.mubr.msk.f32.mxu0 %vm54_vm0, %v230_v26 }
 0x1a7   :  { %412 = vmatmul.mubr.msk.f32.vlgmr.msra.gmra.mxu0 %vm54_vm0, %v231_v27 }
 0x267   :  { %v413_v29 = vpop.f32.mrf.mxu0 }
 0x268   :  { %v321_v30 = vadd.f32 %v413_v29, %v360_v28 }
 0x269   :  { %v315_v31 = vpop.f32.mrf.mxu0 }
 0x26a   :  { %v325_v32 = vsub.f32 0.0, %v321_v30  ;;  %v316_v33 = vadd.f32 %v360_v28, %v315_v31 }
 0x26c   :  { %v328_v34 = vmul.f32 1.442695, %v325_v32  ;;  %v324_v35 = vsub.f32 0.0, %v316_v33 }
 0x26e   :  { %418 = vpow2.f32 %v328_v34  ;;  %v326_v36 = vmul.f32 1.442695, %v324_v35 }
 0x270   :  { %420 = vpow2.f32 %v326_v36 }
 0x27b   :  { %v419_v37 = vpop.eup %418 }
 0x27c   :  { %v331_v38 = vadd.f32 1.0, %v419_v37 }
 0x27d   :  { %v421_v39 = vpop.eup %420 }
 0x27e   :  { %422 = vrcp.f32 %v331_v38  ;;  %v330_v40 = vadd.f32 1.0, %v421_v39 }
 0x280   :  { %424 = vrcp.f32 %v330_v40 }
 0x28b   :  { %v423_v41 = vpop.eup %422 }
 0x28c   :  { %336 = vst.msk [vmem:[#allocation5 + $0x8] sm:$0xff] %vm334_vm1, %v423_v41 }
 0x28d   :  { %v425_v42 = vpop.eup %424 }
 0x28e   :  { %335 = vst.msk [vmem:[#allocation5] sm:$0xff] %vm334_vm1, %v425_v42 }
 0x28f   :  { %457 = shalt.err (!%p454_p9)
}
 0x290   :  { %348 = dma.vmem_to_hbm [thread:$0]  %s343_s5, 256, %s578_s7, [#allocation4], %s471_s27, %s471_s27, %s472_s28  }
 0x291   :  { %468 = dma.done.wait [#allocation4], 256  }
 0x292   :  { %469 = vsyncadd [#allocation4], 4294967040 }
 0x293   :  { %352 = vsyncpa [#allocation3], 1 }
 0x294   :  { %353 = vsyncpa [#allocation4], 1 }

</bundles_post_ra>
